<compile_context>
chip_gen: v5e
topology: v5e:2x2
jax: 0.10.0
libtpu: 0.0.40
codegen_flags: <defaults>
</compile_context>

<pallas_src>
import jax
import jax.numpy as jnp
from jax.experimental import pallas as pl
from jax.experimental.pallas import tpu as pltpu


def _round_up(x, m):
    return (x + m - 1) // m * m


def make_cnn_encoder_kernel(seq_tile, halo, n_taps, out_cols):
    """seq_tile: TS output rows per grid step; halo: rows each side of x tile;
       n_taps: merged tap count K; out_cols: lane-aligned output width Np."""
    N = seq_tile + 2 * halo

    def kernel(x_ref, w_ref, b_ref, o_ref):
        # x_ref: (1, 1, N, D)  bf16  halo'd input window for this (batch, S-tile)
        # w_ref: (K, D, Np)    bf16  merged conv weights (both filters)
        # b_ref: (1, Np)       f32   merged bias
        # o_ref: (1, TS, Np)   f32   output tile (single full-width store)
        xw = x_ref[0, 0]                                                # (N, D)
        # Init accumulator with the broadcast bias -> no epilogue add.
        acc = jnp.broadcast_to(b_ref[...], (N, out_cols)).astype(jnp.float32)
        for k in range(n_taps):                                         # static unroll
            y = jnp.dot(xw, w_ref[k], preferred_element_type=jnp.float32)  # (N, Np)
            # Output row s needs input row s + off_k; align with an XLU roll
            # (free alongside MXU/VPU) instead of a sublane-misaligned slice.
            off_k = k - n_taps // 2 + halo
            sh = (N - off_k) % N
            if sh:
                y = pltpu.roll(y, sh, 0)
            acc = acc + y
        o_ref[0] = acc[:seq_tile]                                       # lane-dense store

    return kernel


def cnn_encoder(x, params, hidden_size, filter_sizes=(3, 5)):
    """x: (B, S, input_size) -> (B, S, hidden_size * len(filter_sizes)) float32."""
    B, S, D = x.shape
    H = hidden_size
    n_f = len(filter_sizes)
    assert all(fs % 2 == 1 for fs in filter_sizes), "odd filter sizes only"
    K = max(filter_sizes)                   # merged tap count
    halo = _round_up(K // 2, 4)             # per-side halo; keeps window 8-row aligned
    H2 = H * n_f
    Np = _round_up(H2, 128)                 # lane-aligned output width

    # ---- pack both conv branches into one (K, D, Np) bf16 weight + bias -----
    w_m = jnp.zeros((K, D, Np), jnp.float32)
    b_m = jnp.zeros((1, Np), jnp.float32)
    for i, fs in enumerate(filter_sizes):
        w, b = params[fs]                   # (fs, D, H), (1, H)
        off = (K - fs) // 2                 # center-align the taps
        w_m = w_m.at[off:off + fs, :, i * H:(i + 1) * H].set(w.astype(jnp.float32))
        b_m = b_m.at[:, i * H:(i + 1) * H].set(b.astype(jnp.float32))
    w_m = w_m.astype(jnp.bfloat16)

    # ---- choose the sequence tile: multiple of 8, <=512 rows ----------------
    nT = -(-S // 512)                       # number of S tiles
    TS = _round_up(-(-S // nT), 8)
    Sp = nT * TS
    N = TS + 2 * halo

    # ---- halo'd, zero-padded input windows: (B, nT, N, D) bf16 --------------
    xb = x.astype(jnp.bfloat16)
    row_idx = jnp.arange(nT)[:, None] * TS + jnp.arange(N)[None, :] - halo   # (nT, N)
    valid = (row_idx >= 0) & (row_idx < S)
    x_win = jnp.take(xb, jnp.clip(row_idx, 0, S - 1), axis=1)                # (B, nT, N, D)
    x_win = jnp.where(valid[None, :, :, None], x_win, 0).astype(jnp.bfloat16)

    kernel = make_cnn_encoder_kernel(TS, halo, K, Np)

    flops = 2 * B * S * sum(filter_sizes) * D * H
    bytes_accessed = int(x_win.size) * 2 + int(w_m.size) * 2 + int(b_m.size) * 4 \
        + B * Sp * Np * 4

    out = pl.pallas_call(
        kernel,
        out_shape=jax.ShapeDtypeStruct((B, Sp, Np), jnp.float32),
        grid_spec=pltpu.PrefetchScalarGridSpec(
            num_scalar_prefetch=0,
            grid=(B, nT),
            in_specs=[
                pl.BlockSpec((1, 1, N, D), lambda b, t: (b, t, 0, 0)),
                pl.BlockSpec((K, D, Np), lambda b, t: (0, 0, 0)),
                pl.BlockSpec((1, Np), lambda b, t: (0, 0)),
            ],
            out_specs=pl.BlockSpec((1, TS, Np), lambda b, t: (b, t, 0)),
        ),
        compiler_params=pltpu.CompilerParams(
            dimension_semantics=("parallel", "parallel")),
        cost_estimate=pl.CostEstimate(
            flops=flops, transcendentals=0, bytes_accessed=bytes_accessed),
    )(x_win, w_m, b_m)

    # Slice padded lanes / padded sequence rows back off.
    return out[:, :S, :H2]


def init_params(key, input_size, hidden_size, filter_sizes=(3, 5)):
    """Deterministic init mimicking nn.Conv2d default (uniform ~ 1/sqrt(fan_in)).

    PyTorch Conv2d weight is (out=H, in=1, kh=fs, kw=input_size); stored here
    tap-major as (fs, input_size, H) so each tap is a ready (D, H) matmul operand.
    """
    params = {}
    for fs in filter_sizes:
        key, kw, kb = jax.random.split(key, 3)
        fan_in = 1 * fs * input_size
        bound = 1.0 / jnp.sqrt(fan_in)
        w = jax.random.uniform(kw, (fs, input_size, hidden_size),
                               minval=-bound, maxval=bound, dtype=jnp.float32)
        b = jax.random.uniform(kb, (1, hidden_size),
                               minval=-bound, maxval=bound, dtype=jnp.float32)
        params[fs] = (w, b)
    return params


def cnn_encoder_ref(x, params, hidden_size, filter_sizes=(3, 5)):
    """Pure-JAX reference (same math as the PyTorch forward, same bf16 casts)."""
    B, S, D = x.shape
    xb = x.astype(jnp.bfloat16)
    outs = []
    for fs in filter_sizes:
        pad = fs // 2
        w, b = params[fs]
        wb = w.astype(jnp.bfloat16)
        xp = jnp.pad(xb, ((0, 0), (pad, pad), (0, 0)))
        acc = jnp.zeros((B, S, hidden_size), jnp.float32)
        for k in range(fs):
            acc = acc + jnp.einsum("bsd,dh->bsh", xp[:, k:k + S, :], wb[k],
                                   preferred_element_type=jnp.float32)
        outs.append(acc + b.astype(jnp.float32)[None, :, :])
    return jnp.concatenate(outs, axis=-1)


if __name__ == "__main__":
    B, S = 2, 8
    input_size, hidden_size = 16, 32
    filter_sizes = (3, 5)

    key = jax.random.PRNGKey(0)
    key, kx = jax.random.split(key)
    x = jax.random.normal(kx, (B, S, input_size), dtype=jnp.float32)

    params = init_params(key, input_size, hidden_size, filter_sizes)

    out = cnn_encoder(x, params, hidden_size, filter_sizes)
    out = jax.block_until_ready(out)

    ref = cnn_encoder_ref(x, params, hidden_size, filter_sizes)
    assert out.shape == (B, S, hidden_size * len(filter_sizes))
    assert jnp.allclose(out, ref, atol=5e-3, rtol=5e-3), \
        float(jnp.max(jnp.abs(out - ref)))

    print("KERNEL_OK")
</pallas_src>

<mosaic_0001>
module attributes {stable_mosaic.version = 11 : i64} {
  func.func @kernel(%arg0: i32, %arg1: i32, %arg2: memref<1x1x16x16xbf16, #tpu.memory_space<vmem>>, %arg3: memref<5x16x128xbf16, #tpu.memory_space<vmem>>, %arg4: memref<1x128xf32, #tpu.memory_space<vmem>>, %arg5: memref<1x8x128xf32, #tpu.memory_space<vmem>>) attributes {dimension_semantics = [#tpu.dimension_semantics<parallel>, #tpu.dimension_semantics<parallel>], iteration_bounds = array<i64: 2, 1>, scalar_prefetch = 0 : i64, scratch_operands = 0 : i64, tpu.core_type = #tpu.core_type<tc>, window_params = [{transform_indices = @transform_0, window_bounds = array<i64: 1, 1, 16, 16>}, {pipeline_mode = #tpu.pipeline_mode<synchronous>, transform_indices = @transform_1, window_bounds = array<i64: 5, 16, 128>}, {pipeline_mode = #tpu.pipeline_mode<synchronous>, transform_indices = @transform_2, window_bounds = array<i64: 1, 128>}, {transform_indices = @transform_3, window_bounds = array<i64: 1, 8, 128>}]} {
    %c0 = arith.constant 0 : index
    %c0_0 = arith.constant 0 : index
    %c0_1 = arith.constant 0 : index
    %c0_2 = arith.constant 0 : index
    %0 = vector.load %arg2[%c0, %c0_0, %c0_1, %c0_2] : memref<1x1x16x16xbf16, #tpu.memory_space<vmem>>, vector<1x1x16x16xbf16>
    %1 = vector.shape_cast %0 : vector<1x1x16x16xbf16> to vector<16x16xbf16>
    %c0_3 = arith.constant 0 : index
    %c0_4 = arith.constant 0 : index
    %2 = vector.load %arg4[%c0_3, %c0_4] : memref<1x128xf32, #tpu.memory_space<vmem>>, vector<1x128xf32>
    %3 = vector.shape_cast %2 : vector<1x128xf32> to vector<1x128xf32>
    %4 = vector.broadcast %3 : vector<1x128xf32> to vector<16x128xf32>
    %c0_5 = arith.constant 0 : index
    %c0_6 = arith.constant 0 : index
    %c0_7 = arith.constant 0 : index
    %5 = vector.load %arg3[%c0_5, %c0_6, %c0_7] : memref<5x16x128xbf16, #tpu.memory_space<vmem>>, vector<1x16x128xbf16>
    %6 = vector.shape_cast %5 : vector<1x16x128xbf16> to vector<16x128xbf16>
    %cst = arith.constant dense<0.000000e+00> : vector<16x128xf32>
    %7 = tpu.matmul %1, %6, %cst {dimension_numbers = #tpu.dot_dimension_numbers<[1], [0], [0], [1], [0, 0, 1, 1], [], []>} : vector<16x16xbf16>, vector<16x128xbf16>, vector<16x128xf32> -> vector<16x128xf32>
    %c14_i32 = arith.constant 14 : i32
    %8 = tpu.dynamic_rotate %7 by %c14_i32 dim 0 : vector<16x128xf32>, i32 -> vector<16x128xf32>
    %9 = arith.addf %4, %8 : vector<16x128xf32>
    %c1 = arith.constant 1 : index
    %c0_8 = arith.constant 0 : index
    %c0_9 = arith.constant 0 : index
    %10 = vector.load %arg3[%c1, %c0_8, %c0_9] : memref<5x16x128xbf16, #tpu.memory_space<vmem>>, vector<1x16x128xbf16>
    %11 = vector.shape_cast %10 : vector<1x16x128xbf16> to vector<16x128xbf16>
    %cst_10 = arith.constant dense<0.000000e+00> : vector<16x128xf32>
    %12 = tpu.matmul %1, %11, %cst_10 {dimension_numbers = #tpu.dot_dimension_numbers<[1], [0], [0], [1], [0, 0, 1, 1], [], []>} : vector<16x16xbf16>, vector<16x128xbf16>, vector<16x128xf32> -> vector<16x128xf32>
    %c13_i32 = arith.constant 13 : i32
    %13 = tpu.dynamic_rotate %12 by %c13_i32 dim 0 : vector<16x128xf32>, i32 -> vector<16x128xf32>
    %14 = arith.addf %9, %13 : vector<16x128xf32>
    %c2 = arith.constant 2 : index
    %c0_11 = arith.constant 0 : index
    %c0_12 = arith.constant 0 : index
    %15 = vector.load %arg3[%c2, %c0_11, %c0_12] : memref<5x16x128xbf16, #tpu.memory_space<vmem>>, vector<1x16x128xbf16>
    %16 = vector.shape_cast %15 : vector<1x16x128xbf16> to vector<16x128xbf16>
    %cst_13 = arith.constant dense<0.000000e+00> : vector<16x128xf32>
    %17 = tpu.matmul %1, %16, %cst_13 {dimension_numbers = #tpu.dot_dimension_numbers<[1], [0], [0], [1], [0, 0, 1, 1], [], []>} : vector<16x16xbf16>, vector<16x128xbf16>, vector<16x128xf32> -> vector<16x128xf32>
    %c12_i32 = arith.constant 12 : i32
    %18 = tpu.dynamic_rotate %17 by %c12_i32 dim 0 : vector<16x128xf32>, i32 -> vector<16x128xf32>
    %19 = arith.addf %14, %18 : vector<16x128xf32>
    %c3 = arith.constant 3 : index
    %c0_14 = arith.constant 0 : index
    %c0_15 = arith.constant 0 : index
    %20 = vector.load %arg3[%c3, %c0_14, %c0_15] : memref<5x16x128xbf16, #tpu.memory_space<vmem>>, vector<1x16x128xbf16>
    %21 = vector.shape_cast %20 : vector<1x16x128xbf16> to vector<16x128xbf16>
    %cst_16 = arith.constant dense<0.000000e+00> : vector<16x128xf32>
    %22 = tpu.matmul %1, %21, %cst_16 {dimension_numbers = #tpu.dot_dimension_numbers<[1], [0], [0], [1], [0, 0, 1, 1], [], []>} : vector<16x16xbf16>, vector<16x128xbf16>, vector<16x128xf32> -> vector<16x128xf32>
    %c11_i32 = arith.constant 11 : i32
    %23 = tpu.dynamic_rotate %22 by %c11_i32 dim 0 : vector<16x128xf32>, i32 -> vector<16x128xf32>
    %24 = arith.addf %19, %23 : vector<16x128xf32>
    %c4 = arith.constant 4 : index
    %c0_17 = arith.constant 0 : index
    %c0_18 = arith.constant 0 : index
    %25 = vector.load %arg3[%c4, %c0_17, %c0_18] : memref<5x16x128xbf16, #tpu.memory_space<vmem>>, vector<1x16x128xbf16>
    %26 = vector.shape_cast %25 : vector<1x16x128xbf16> to vector<16x128xbf16>
    %cst_19 = arith.constant dense<0.000000e+00> : vector<16x128xf32>
    %27 = tpu.matmul %1, %26, %cst_19 {dimension_numbers = #tpu.dot_dimension_numbers<[1], [0], [0], [1], [0, 0, 1, 1], [], []>} : vector<16x16xbf16>, vector<16x128xbf16>, vector<16x128xf32> -> vector<16x128xf32>
    %c10_i32 = arith.constant 10 : i32
    %28 = tpu.dynamic_rotate %27 by %c10_i32 dim 0 : vector<16x128xf32>, i32 -> vector<16x128xf32>
    %29 = arith.addf %24, %28 : vector<16x128xf32>
    %30 = vector.extract_strided_slice %29 {offsets = [0, 0], sizes = [8, 128], strides = [1, 1]} : vector<16x128xf32> to vector<8x128xf32>
    %c0_20 = arith.constant 0 : index
    %c0_21 = arith.constant 0 : index
    %c0_22 = arith.constant 0 : index
    %31 = vector.load %arg5[%c0_20, %c0_21, %c0_22] : memref<1x8x128xf32, #tpu.memory_space<vmem>>, vector<1x8x128xf32>
    %32 = vector.shape_cast %31 : vector<1x8x128xf32> to vector<8x128xf32>
    %33 = vector.shape_cast %30 : vector<8x128xf32> to vector<1x8x128xf32>
    tpu.vector_store %arg5[%c0_20, %c0_21, %c0_22], %33 {strides = array<i32>} : memref<1x8x128xf32, #tpu.memory_space<vmem>>, vector<1x8x128xf32>,
    return
  }
  func.func @transform_0(%arg0: i32, %arg1: i32) -> (i32, i32, i32, i32) {
    %c0_i32 = arith.constant 0 : i32
    %c0_i32_0 = arith.constant 0 : i32
    %c0_i32_1 = arith.constant 0 : i32
    return %arg0, %arg1, %c0_i32, %c0_i32_0 : i32, i32, i32, i32
  }
  func.func @transform_1(%arg0: i32, %arg1: i32) -> (i32, i32, i32) {
    %c0_i32 = arith.constant 0 : i32
    %c0_i32_0 = arith.constant 0 : i32
    %c0_i32_1 = arith.constant 0 : i32
    %c0_i32_2 = arith.constant 0 : i32
    return %c0_i32, %c0_i32_0, %c0_i32_1 : i32, i32, i32
  }
  func.func @transform_2(%arg0: i32, %arg1: i32) -> (i32, i32) {
    %c0_i32 = arith.constant 0 : i32
    %c0_i32_0 = arith.constant 0 : i32
    %c0_i32_1 = arith.constant 0 : i32
    return %c0_i32, %c0_i32_0 : i32, i32
  }
  func.func @transform_3(%arg0: i32, %arg1: i32) -> (i32, i32, i32) {
    %c0_i32 = arith.constant 0 : i32
    %c0_i32_0 = arith.constant 0 : i32
    return %arg0, %arg1, %c0_i32 : i32, i32, i32
  }
}

</mosaic_0001>

<bundles_post_ra>
// kernel: tpu_custom_call.1
= control target key start
LH: loop header
LB: loop body
LE: loop exit
PB: predicated region body
PF: predicated region fallthrough
CT: control target
= control target key end

     0   :  { %s954_s0 = inlined_call_operand.hbm [shape: bf16[2,1,16,16], index: 0, kind: input, shape index: {}]   ;;  %s955_s1 = inlined_call_operand.hbm [shape: bf16[5,16,128], index: 1, kind: input, shape index: {}]   ;;  %s956_s2 = inlined_call_operand.vmem [shape: f32[1,128], index: 2, kind: input, shape index: {}]   ;;  %s957_s3 = inlined_call_operand.hbm [shape: f32[2,8,128], index: 3, kind: output, shape index: {}]  }
   0x1   :  { %959 = sst [smem:[#allocation11_spill]] %s955_s1 }
   0x2   :  { %8 = vsyncpa [#allocation3], 0 }
   0x3   :  { %10 = vsyncpa [#allocation3 + $0x1], 0 }
   0x4   :  { %11 = vsyncpa [#allocation6], 0 }
   0x5   :  { %12 = vsyncpa [#allocation4], 0 }
   0x6   :  { %14 = vsyncpa [#allocation4 + $0x1], 0  ;;  %s792_s12 = smov 0   ;;  %s794_s13 = smov 0  }
   0x7   :  { %s796_s14 = smov 0   ;;  %s798_s15 = smov 0  }
   0x8   :  { %s800_s16 = smov 0   ;;  %s802_s17 = smov 0  }
   0x9 LB: > { %s493_s18 = sadd.s32 4294967295, %s767_s17   ;;  %s494_s19 = sadd.s32 4294967294, %s767_s17   ;;  %s767_s17 = sphi %s802_s17, %s20_s17   ;;  %s763_s16 = sphi %s800_s16, %s973_s16   ;;  %s759_s15 = sphi %s798_s15, %s972_s15   ;;  %s755_s14 = sphi %s796_s14, %s971_s14   ;;  %s751_s13 = sphi %s794_s13, %s970_s13   ;;  %s747_s12 = sphi %s792_s12, %s969_s12  }
   0xa   : > { %p54_p0 = scmp.ne.s32.totalorder %s751_s13, %s747_s12  ;;  %p826_p1 = scmp.eq.s32.totalorder %s493_s18, 0 }
   0xb   : > { %p830_p2 = scmp.eq.s32.totalorder %s493_s18, 1  ;;  %p128_p3 = scmp.eq.s32.totalorder %s494_s19, 1 }
   0xc   : > { %p836_p4 = por %p826_p1, %p54_p0  ;;  %p495_p5 = scmp.ge.s32.totalorder %s767_s17, 1 }
   0xd   : > { %p841_p6 = por %p128_p3, %p54_p0  ;;  %p135_p7 = scmp.lt.s32.totalorder %s767_s17, 3 }
   0xe   : > { %s964_s1 = sld [smem:[#allocation11_spill]]  ;;  %s769_s28 = smov [#allocation5]  }
   0xf   : > { %p849_p8 = pnand %p495_p5, %p135_p7  ;;  %s148_s29 = sshll.u32 %s769_s28, 4  ;;  %s149_s29 = int_to_ptr.vmem [resolvable:$true] %s148_s29 }
  0x10   : > { %p497_p11 = scmp.ge.s32.totalorder %s767_s17, 2  ;;  %s958_s30 = smov 64  }
  0x11   : > { %p553_p9 = pneg %p849_p8  ;;  %s771_s4 = smov 4  }
  0x12   : > { %s32_s5 = sadd.s32 1, %s763_s16  ;;  %s41_s6 = sadd.s32 1, %s755_s14 }
  0x13   : > { %p554_p10 = pnand %p553_p9, %p826_p1  ;;  %p34_p12 = scmp.ge.s32.totalorder %s32_s5, 2 }
  0x14   : > { %s146_s26 = sshll.u32 %s964_s1, 4  ;;  %p48_p13 = scmp.ne.s32.totalorder %s755_s14, %s751_s13  ;;  %s147_s26 = int_to_ptr.hbm [resolvable:$true] %s146_s26 }
  0x15   : > { %556 = dma.hbm_to_vmem [thread:$0]  (!%p554_p10), %s147_s26, 640, %s149_s29, [#allocation6], %s958_s30, %s958_s30, %s771_s4  }
  0x16   : > { %p49_p0 = scmp.eq.s32.totalorder %s767_s17, 0  ;;  %s975_s5 = smov (%p34_p12, %s32_s5), 0 }
  0x17   : > { %p874_p5 = por %p830_p2, %p48_p13  ;;  %s36_s9 = ssub.s32 %s763_s16, %s975_s5 }
  0x18   : > { %p868_p3 = por %p49_p0, %p48_p13  ;;  %p566_p7 = scmp.lt.s32.totalorder %s767_s17, 2 }
  0x19   : > { %p39_p9 = scmp.eq.s32.totalorder %s36_s9, 0  ;;  %s165_s10 = sand.u32 1, %s755_s14  }
  0x1a   : > { %s498_s11 = sshll.u32 %s165_s10, 3  ;;  %s538_s19 = sshll.u32 %s763_s16, 3 }
  0x1b   : > { %s883_s18 = scalar_select %p39_p9, %s755_s14, %s41_s6  }
  0x1c   : > { %s176_s26 = scalar_lea.hbm %s954_s0, %s538_s19  ;;  %s169_s28 = scalar_lea.vmem [#allocation2], %s498_s11 }
  0x1d   : > { %s179_s29 = sshll.u32 %s169_s28, 4  ;;  %s177_s21 = sshll.u32 %s176_s26, 4  ;;  %s180_s29 = int_to_ptr.vmem [resolvable:$true] %s179_s29  ;;  %s178_s21 = int_to_ptr.hbm [resolvable:$true] %s177_s21 }
  0x1e   : > { %p558_p2 = pnand %p566_p7, %p868_p3  ;;  %s166_s30 = scalar_lea.sflag [#allocation3], %s165_s10 }
  0x1f   : > { %s968_s1 = smov 64   ;;  %191 = sbr.rel (%p849_p8) target bundleno = 201 (0xc9), region = 32 }
  0x20   : > { %560 = dma.hbm_to_vmem [thread:$0]  (!%p558_p2), %s178_s21, 128, %s180_s29, %s166_s30, %s968_s1, %s968_s1, %s771_s4  }
  0x21   : > { %s897_s6 = sand.u32 (!%p849_p8), 1, %s751_s13  }
  0x22   : > { %s502_s9 = sshll.u32 (!%p849_p8), %s897_s6, 3  ;;  %s194_s11 = scalar_lea.sflag (!%p849_p8), [#allocation3], %s897_s6 }
  0x23   : > { %s197_s7 = scalar_lea.vmem (!%p849_p8), [#allocation2], %s502_s9 }
  0x24   : > { %734 = dma.done.wait (%p836_p4), %s194_s11, 128  }
  0x25   : > { %736 = vsyncadd (%p836_p4), %s194_s11, 4294967168 }
  0x26   : > { %738 = dma.done.wait (%p826_p1), [#allocation6], 640  }
  0x27   : > { %740 = vsyncadd (%p826_p1), [#allocation6], 4294966656  ;;  %v540_v0 = vld [vmem:[#allocation5] sm:$0xff]  ;;  %v542_v1 = vld [vmem:[#allocation5 + $0x10] sm:$0xff]  ;;  %vm246_vm0 = vcmask 130048   ;;  %v266_v8 = vlaneseq  ;;  %s535_s22 = sshll.u32 %s759_s15, 3 }
  0x28   : > { %v543_v2 = vld [vmem:[#allocation5 + $0x18] sm:$0xff]  ;;  %v541_v3 = vld [vmem:[#allocation5 + $0x8] sm:$0xff]  ;;  %v544_v5 = vld [vmem:[#allocation5 + $0x20] sm:$0xff]  ;;  %257 = vmatpush.bf16.msra.mxu0 %v540_v0  ;;  %315 = vmatpush.bf16.msra.mxu2 %v542_v1  ;;  %s396_s4 = scalar_lea.hbm %s957_s3, %s535_s22  ;;  %s225_s10 = scalar_lea.vmem [#allocation7], %s502_s9 }
  0x29   : > { %v539_v4 = vld [vmem:[%s197_s7] sm:$0xff]  ;;  %343 = vmatpush.bf16.msra.mxu3 %v543_v2  ;;  %287 = vmatpush.bf16.msra.mxu1 %v541_v3  ;;  %v267_v10 = vshrl.u32 %v266_v8, 7  ;;  %s398_s19 = sshll.u32 %s225_s10, 4  ;;  %s400_s15 = sshll.u32 %s396_s4, 4  ;;  %s399_s19 = int_to_ptr.vmem [resolvable:$true] %s398_s19  ;;  %s401_s15 = int_to_ptr.hbm [resolvable:$true] %s400_s15 }
  0x2a   : > { %v620_v16 = vld [vmem:[%s956_s2] ss:$0 sm:$0xff]  ;;  %s385_s24 = scalar_lea.sflag [#allocation4], %s897_s6  ;;  %s695_s25 = sshra.s32 %s401_s15, 4  ;;  %s696_s25 = int_to_ptr.hbm [resolvable:$true] %s695_s25 }
  0x2b   : > { %513 = vmatmul.msk.bf16.vlgmr.msra.gmra.mxu0 %vm246_vm0, %v539_v4  ;;  %523 = vmatmul.msk.bf16.vlgmr.msra.gmra.mxu2 %vm246_vm0, %v539_v4  ;;  %vm268_vm1 = vcmp.lt.s32.totalorder %v267_v10, 6  ;;  %vm296_vm2 = vcmp.lt.s32.totalorder %v267_v10, 5  ;;  %vm324_vm3 = vcmp.lt.s32.totalorder %v267_v10, 4  ;;  %vm352_vm4 = vcmp.lt.s32.totalorder %v267_v10, 3  ;;  %s697_s26 = scalar_lea.hbm %s696_s25, 8  ;;  %s701_s21 = scalar_lea.hbm %s957_s3, 16 }
  0x2c   : > { %371 = vmatpush.bf16.msrb.mxu0 %v544_v5  ;;  %528 = vmatmul.msk.bf16.vlgmr.msra.gmra.mxu3 %vm246_vm0, %v539_v4  ;;  %vm380_vm5 = vcmp.lt.s32.totalorder %v267_v10, 2  ;;  %p698_p1 = scmp.ne.s32.totalorder %s696_s25, %s697_s26  ;;  %p702_p10 = scmp.lt.s32.totalorder %s696_s25, %s957_s3 }
  0x2d   : > { %518 = vmatmul.msk.bf16.vlgmr.msra.gmra.mxu1 %vm246_vm0, %v539_v4  ;;  %p703_p12 = scmp.lt.s32.totalorder %s701_s21, %s697_s26 }
  0x2e   : > { %p699_p4 = pnand %p698_p1, %p874_p5 }
  0x2f   : > { %p704_p13 = por %p703_p12, %p702_p10 }
  0x30   : > { %p700_p8 = pneg %p699_p4 }
  0x32   : > { %p705_p0 = pnand %p704_p13, %p700_p8 }
  0x3b   : > { %533 = vmatmul.msk.bf16.vlgmr.msrb.gmra.mxu0 %vm246_vm0, %v539_v4 }
  0xa8   : > { %v259_v6 = vpop.f32.mrf.mxu0 }
  0xa9   : > { %v264_v15 = vrot.slane %v259_v6, 2 }
  0xaa   : > { %v289_v7 = vpop.f32.mrf.mxu1 }
  0xab   : > { %v294_v17 = vrot.slane %v289_v7, 3 }
  0xae   : > { %v317_v9 = vpop.f32.mrf.mxu2 }
  0xaf   : > { %v345_v11 = vpop.f32.mrf.mxu3  ;;  %v322_v24 = vrot.slane %v317_v9, 4 }
  0xb0   : > { %v261_v12 = vpop.f32.mrf.mxu0  ;;  %v350_v29 = vrot.slane %v345_v11, 5 }
  0xb1   : > { %v265_v13 = vrot.slane %v261_v12, 2 }
  0xb2   : > { %v291_v14 = vpop.f32.mrf.mxu1 }
  0xb3   : > { %v269_v18 = vsel %vm268_vm1, %v264_v15, %v265_v13  ;;  %v295_v19 = vrot.slane %v291_v14, 3 }
  0xb4   : > { %v270_v22 = vadd.f32 %v620_v16, %v269_v18 }
  0xb5   : > { %v297_v25 = vsel %vm296_vm2, %v294_v17, %v295_v19 }
  0xb6   : > { %v319_v20 = vpop.f32.mrf.mxu2  ;;  %v298_v28 = vadd.f32 %v297_v25, %v270_v22 }
  0xb7   : > { %v323_v21 = vrot.slane %v319_v20, 4  ;;  %v347_v26 = vpop.f32.mrf.mxu3 }
  0xb8   : > { %v373_v23 = vpop.f32.mrf.mxu0  ;;  %v351_v30 = vrot.slane %v347_v26, 5 }
  0xb9   : > { %v325_v27 = vsel %vm324_vm3, %v322_v24, %v323_v21  ;;  %v378_v34 = vrot.slane %v373_v23, 6 }
  0xba   : > { %v326_v31 = vadd.f32 %v325_v27, %v298_v28  ;;  %v353_v33 = vsel %vm352_vm4, %v350_v29, %v351_v30 }
  0xbc   : > { %v354_v36 = vadd.f32 %v353_v33, %v326_v31 }
  0xc0   : > { %v375_v32 = vpop.f32.mrf.mxu0 }
  0xc1   : > { %v379_v35 = vrot.slane %v375_v32, 6 }
  0xc3   : > { %v381_v37 = vsel %vm380_vm5, %v378_v34, %v379_v35 }
  0xc4   : > { %v382_v38 = vadd.f32 %v381_v37, %v354_v36 }
  0xc6   : > { %383 = vst [vmem:[%s225_s10] sm:$0xff] %v382_v38 }
  0xc7   : > { %708 = shalt.err (!%p705_p0)
}
  0xc8   : > { %551 = dma.vmem_to_hbm [thread:$0]  (%p874_p5), %s399_s19, 128, %s401_s15, %s385_s24  }
  0xc9 PF: > { %s412_s6 = sand.u32 1, %s747_s12   ;;  %p562_p3 = pnand %p497_p11, %p841_p6 }
  0xca   : > { %s413_s7 = scalar_lea.sflag [#allocation4], %s412_s6 }
  0xcb   : > { %p563_p7 = pneg %p562_p3 }
  0xcd   : > { %742 = dma.done.wait (%p563_p7), %s413_s7, 128  }
  0xce   : > { %744 = vsyncadd (%p563_p7), %s413_s7, 4294967168  ;;  %s20_s17 = sadd.s32 1, %s767_s17   ;;  %s969_s12 = smov %s751_s13 }
  0xcf   : > { %p17_p9 = scmp.ge.s32.totalorder %s20_s17, 4   ;;  %s970_s13 = smov %s755_s14 }
  0xd0   : > { %s971_s14 = smov %s883_s18  ;;  %s972_s15 = smov %s763_s16 }
  0xd1   : > { %s973_s16 = smov %s975_s5  ;;  %19 = sbr.rel (!%p17_p9) target bundleno = 9 (0x9), region = 85 }
  0xd6   :  { %419 = vsyncpa [#allocation3], 1 }
  0xd7   :  { %421 = vsyncpa [#allocation3 + $0x1], 1 }
  0xd8   :  { %422 = vsyncpa [#allocation6], 1 }
  0xd9   :  { %423 = vsyncpa [#allocation4], 1 }
  0xda   :  { %425 = vsyncpa [#allocation4 + $0x1], 1 }

</bundles_post_ra>
